<compile_context>
chip_gen: v5e
topology: v5e:2x2
jax: 0.10.0
libtpu: 0.0.40
codegen_flags: <defaults>
</compile_context>

<pallas_src>
import functools

import jax
import jax.numpy as jnp
from jax.experimental import pallas as pl
from jax.experimental.pallas import tpu as pltpu

LN_EPS = 1e-5  # torch.nn.LayerNorm default


def _layernorm(h, gamma, beta):
    """f32 LayerNorm over the last (lane) axis, centered two-pass form."""
    mu = jnp.mean(h, axis=-1, keepdims=True)
    c = h - mu
    var = jnp.mean(c * c, axis=-1, keepdims=True)   # biased, like torch LN
    return c * jax.lax.rsqrt(var + LN_EPS) * gamma + beta


def critic_kernel(sa_ref, w1_ref, w2_ref, wa_ref, v1_ref, v2_ref, out_ref,
                  *, obs_dim, act_dim):
    sa = sa_ref[...]                       # [TB, obs+act] f32 (single load)
    x = sa[:, 0:obs_dim]                   # static lane slices
    a = sa[:, obs_dim:obs_dim + act_dim]

    # packed per-feature vectors (static row slices, stay f32)
    b1, g1, be1 = v1_ref[0:1, :], v1_ref[1:2, :], v1_ref[2:3, :]
    b2, g2, be2 = v2_ref[0:1, :], v2_ref[1:2, :], v2_ref[2:3, :]
    ba = v2_ref[3:4, :]
    wq = v2_ref[4:5, :]                    # q weight stored as a row
    bq = v2_ref[5:6, 0:1]                  # scalar broadcast row -> (1, 1)

    # --- state_value = relu(LayerNorm(fc1(state))) --------------------------
    h1 = jnp.dot(x.astype(jnp.bfloat16), w1_ref[...],
                 preferred_element_type=jnp.float32) + b1
    h1 = jnp.maximum(_layernorm(h1, g1, be1), 0.0)

    # --- state_value = LayerNorm(fc2(state_value))  (no ReLU here) ----------
    h2 = jnp.dot(h1.astype(jnp.bfloat16), w2_ref[...],
                 preferred_element_type=jnp.float32) + b2
    h2 = _layernorm(h2, g2, be2)

    # --- action_value = relu(action_value(action)) --------------------------
    av = jnp.dot(a.astype(jnp.bfloat16), wa_ref[...],
                 preferred_element_type=jnp.float32) + ba
    av = jnp.maximum(av, 0.0)

    # --- state_action_value = relu(state_value + action_value) --------------
    sav = jnp.maximum(h2 + av, 0.0)

    # --- q head: VPU multiply + lane reduce (avoids N=1 MXU matmul) ---------
    q = jnp.sum(sav * wq, axis=-1, keepdims=True) + bq      # [TB, 1]
    # lane-dense store: (TB,1) -> (1,TB) is one XLU relayout
    out_ref[...] = q.reshape(1, q.shape[0]).astype(out_ref.dtype)


def _spec(shape, index_map, buffers=None):
    """BlockSpec with optional buffer-count hint; falls back if unsupported."""
    if buffers is not None and hasattr(pl, "Buffered"):
        try:
            return pl.BlockSpec(shape, index_map,
                                pipeline_mode=pl.Buffered(buffers))
        except TypeError:
            pass
    return pl.BlockSpec(shape, index_map)


def critic_forward(state, action, params):
    B, obs_dim = state.shape
    act_dim = action.shape[1]
    fc1 = params["w1"].shape[1]
    fc2 = params["w2"].shape[1]

    # Whole batch in one step when small; otherwise 512-row tiles (>= 2 tiles
    # keeps the second TensorCore busy on v7x for big replay batches).
    tb = B if B <= 512 else 512
    num_tiles = pl.cdiv(B, tb)
    b_pad = num_tiles * tb

    # Single streamed input: [state | action], zero-padded batch rows so the
    # last tile's LayerNorm never sees uninitialized VMEM.
    sa = jnp.concatenate([state, action], axis=1)
    if b_pad != B:
        sa = jnp.pad(sa, ((0, b_pad - B), (0, 0)))

    kern = functools.partial(critic_kernel, obs_dim=obs_dim, act_dim=act_dim)

    batch_map = lambda i: (i, 0)
    resident = lambda i: (0, 0)   # weights / packed vectors stay VMEM-resident

    flops = 2 * b_pad * (obs_dim * fc1 + fc1 * fc2 + act_dim * fc2)
    bytes_accessed = (4 * sa.size
                      + 2 * (params["w1"].size + params["w2"].size
                             + params["wa"].size)
                      + 4 * (params["vec1"].size + params["vec2"].size)
                      + 4 * b_pad)

    out_row = pl.pallas_call(
        kern,
        out_shape=jax.ShapeDtypeStruct((1, b_pad), jnp.float32),
        grid=(num_tiles,),
        in_specs=[
            _spec((tb, obs_dim + act_dim), batch_map),
            _spec((obs_dim, fc1), resident, buffers=1),
            _spec((fc1, fc2), resident, buffers=1),
            _spec((act_dim, fc2), resident, buffers=1),
            _spec((3, fc1), resident, buffers=1),
            _spec((6, fc2), resident, buffers=1),
        ],
        out_specs=pl.BlockSpec((1, tb), lambda i: (0, i)),
        compiler_params=pltpu.CompilerParams(
            dimension_semantics=("parallel",)),
        cost_estimate=pl.CostEstimate(flops=int(flops),
                                      transcendentals=int(2 * b_pad),
                                      bytes_accessed=int(bytes_accessed)),
    )(sa, params["w1"], params["w2"], params["wa"],
      params["vec1"], params["vec2"])

    return out_row[0, :B].reshape(B, 1)


def init_params(key, obs_dim, action_dim, fc1_dims, fc2_dims):
    """Deterministic init mirroring the module's __init__ (uniform ranges).

    Weights for the three big matmuls are stored [in, out] in bf16; all
    per-feature vectors are packed (f32) into vec1 [3, fc1] and vec2 [6, fc2].
    """
    ks = jax.random.split(key, 8)
    f1 = 1.0 / jnp.sqrt(fc1_dims)        # torch: 1/sqrt(fc1.weight.size()[0])
    f2 = 1.0 / jnp.sqrt(fc2_dims)
    f3 = 0.003
    fa = 1.0 / jnp.sqrt(action_dim)      # approx default init for action_value

    w1 = jax.random.uniform(ks[0], (obs_dim, fc1_dims), jnp.float32, -f1, f1)
    b1 = jax.random.uniform(ks[1], (fc1_dims,), jnp.float32, -f1, f1)
    w2 = jax.random.uniform(ks[2], (fc1_dims, fc2_dims), jnp.float32, -f2, f2)
    b2 = jax.random.uniform(ks[3], (fc2_dims,), jnp.float32, -f2, f2)
    wa = jax.random.uniform(ks[4], (action_dim, fc2_dims), jnp.float32, -fa, fa)
    ba = jax.random.uniform(ks[5], (fc2_dims,), jnp.float32, -fa, fa)
    wq = jax.random.uniform(ks[6], (fc2_dims,), jnp.float32, -f3, f3)
    bq = jax.random.uniform(ks[7], (), jnp.float32, -f3, f3)

    g1 = jnp.ones((fc1_dims,), jnp.float32)    # LayerNorm 1 weight
    be1 = jnp.zeros((fc1_dims,), jnp.float32)  # LayerNorm 1 bias
    g2 = jnp.ones((fc2_dims,), jnp.float32)
    be2 = jnp.zeros((fc2_dims,), jnp.float32)

    return {
        "w1": w1.astype(jnp.bfloat16),
        "w2": w2.astype(jnp.bfloat16),
        "wa": wa.astype(jnp.bfloat16),
        "vec1": jnp.stack([b1, g1, be1], axis=0),                      # [3, fc1]
        "vec2": jnp.stack([b2, g2, be2, ba, wq,
                           jnp.full((fc2_dims,), bq, jnp.float32)], 0),  # [6, fc2]
    }


def reference_forward(state, action, p):
    """Pure-JAX reference of the PyTorch forward (same bf16 matmul operands)."""
    b1, g1, be1 = p["vec1"][0:1], p["vec1"][1:2], p["vec1"][2:3]
    b2, g2, be2 = p["vec2"][0:1], p["vec2"][1:2], p["vec2"][2:3]
    ba, wq = p["vec2"][3:4], p["vec2"][4:5]
    bq = p["vec2"][5, 0]

    h1 = jnp.dot(state.astype(jnp.bfloat16), p["w1"],
                 preferred_element_type=jnp.float32) + b1
    mu = h1.mean(-1, keepdims=True)
    var = ((h1 - mu) ** 2).mean(-1, keepdims=True)
    h1 = jax.nn.relu((h1 - mu) / jnp.sqrt(var + LN_EPS) * g1 + be1)

    h2 = jnp.dot(h1.astype(jnp.bfloat16), p["w2"],
                 preferred_element_type=jnp.float32) + b2
    mu2 = h2.mean(-1, keepdims=True)
    var2 = ((h2 - mu2) ** 2).mean(-1, keepdims=True)
    h2 = (h2 - mu2) / jnp.sqrt(var2 + LN_EPS) * g2 + be2

    av = jax.nn.relu(jnp.dot(action.astype(jnp.bfloat16), p["wa"],
                             preferred_element_type=jnp.float32) + ba)
    sav = jax.nn.relu(h2 + av)
    return jnp.sum(sav * wq, axis=-1, keepdims=True) + bq


if __name__ == "__main__":
    B, OBS_DIM, ACT_DIM = 8, 32, 8
    FC1, FC2 = 128, 128   # lane-aligned small stand-ins for 400 / 300

    key = jax.random.PRNGKey(0)
    k_state, k_action, k_params = jax.random.split(key, 3)
    state = jax.random.normal(k_state, (B, OBS_DIM), jnp.float32)
    action = jax.random.normal(k_action, (B, ACT_DIM), jnp.float32)
    params = init_params(k_params, OBS_DIM, ACT_DIM, FC1, FC2)

    q = critic_forward(state, action, params)
    q = jax.block_until_ready(q)

    q_ref = reference_forward(state, action, params)
    assert q.shape == (B, 1)
    assert jnp.allclose(q, q_ref, atol=1e-3, rtol=1e-3), (q, q_ref)

    print("KERNEL_OK")
</pallas_src>

<mosaic_0001>
module attributes {stable_mosaic.version = 11 : i64} {
  func.func @critic_kernel(%arg0: i32, %arg1: memref<8x40xf32, #tpu.memory_space<vmem>>, %arg2: memref<32x128xbf16, #tpu.memory_space<vmem>>, %arg3: memref<128x128xbf16, #tpu.memory_space<vmem>>, %arg4: memref<8x128xbf16, #tpu.memory_space<vmem>>, %arg5: memref<3x128xf32, #tpu.memory_space<vmem>>, %arg6: memref<6x128xf32, #tpu.memory_space<vmem>>, %arg7: memref<1x8xf32, #tpu.memory_space<vmem>>) attributes {dimension_semantics = [#tpu.dimension_semantics<parallel>], iteration_bounds = array<i64: 1>, scalar_prefetch = 0 : i64, scratch_operands = 0 : i64, tpu.core_type = #tpu.core_type<tc>, window_params = [{transform_indices = @transform_0, window_bounds = array<i64: 8, 40>}, {pipeline_mode = #tpu.pipeline_mode<synchronous>, transform_indices = @transform_1, window_bounds = array<i64: 32, 128>}, {pipeline_mode = #tpu.pipeline_mode<synchronous>, transform_indices = @transform_2, window_bounds = array<i64: 128, 128>}, {pipeline_mode = #tpu.pipeline_mode<synchronous>, transform_indices = @transform_3, window_bounds = array<i64: 8, 128>}, {pipeline_mode = #tpu.pipeline_mode<synchronous>, transform_indices = @transform_4, window_bounds = array<i64: 3, 128>}, {pipeline_mode = #tpu.pipeline_mode<synchronous>, transform_indices = @transform_5, window_bounds = array<i64: 6, 128>}, {transform_indices = @transform_6, window_bounds = array<i64: 1, 8>}]} {
    %c0 = arith.constant 0 : index
    %c0_0 = arith.constant 0 : index
    %0 = vector.load %arg1[%c0, %c0_0] : memref<8x40xf32, #tpu.memory_space<vmem>>, vector<8x40xf32>
    %1 = vector.extract_strided_slice %0 {offsets = [0, 0], sizes = [8, 32], strides = [1, 1]} : vector<8x40xf32> to vector<8x32xf32>
    %2 = vector.extract_strided_slice %0 {offsets = [0, 32], sizes = [8, 8], strides = [1, 1]} : vector<8x40xf32> to vector<8x8xf32>
    %c0_1 = arith.constant 0 : index
    %c0_2 = arith.constant 0 : index
    %3 = vector.load %arg5[%c0_1, %c0_2] : memref<3x128xf32, #tpu.memory_space<vmem>>, vector<1x128xf32>
    %c1 = arith.constant 1 : index
    %c0_3 = arith.constant 0 : index
    %4 = vector.load %arg5[%c1, %c0_3] : memref<3x128xf32, #tpu.memory_space<vmem>>, vector<1x128xf32>
    %c2 = arith.constant 2 : index
    %c0_4 = arith.constant 0 : index
    %5 = vector.load %arg5[%c2, %c0_4] : memref<3x128xf32, #tpu.memory_space<vmem>>, vector<1x128xf32>
    %c0_5 = arith.constant 0 : index
    %c0_6 = arith.constant 0 : index
    %6 = vector.load %arg6[%c0_5, %c0_6] : memref<6x128xf32, #tpu.memory_space<vmem>>, vector<1x128xf32>
    %c1_7 = arith.constant 1 : index
    %c0_8 = arith.constant 0 : index
    %7 = vector.load %arg6[%c1_7, %c0_8] : memref<6x128xf32, #tpu.memory_space<vmem>>, vector<1x128xf32>
    %c2_9 = arith.constant 2 : index
    %c0_10 = arith.constant 0 : index
    %8 = vector.load %arg6[%c2_9, %c0_10] : memref<6x128xf32, #tpu.memory_space<vmem>>, vector<1x128xf32>
    %c3 = arith.constant 3 : index
    %c0_11 = arith.constant 0 : index
    %9 = vector.load %arg6[%c3, %c0_11] : memref<6x128xf32, #tpu.memory_space<vmem>>, vector<1x128xf32>
    %c4 = arith.constant 4 : index
    %c0_12 = arith.constant 0 : index
    %10 = vector.load %arg6[%c4, %c0_12] : memref<6x128xf32, #tpu.memory_space<vmem>>, vector<1x128xf32>
    %c5 = arith.constant 5 : index
    %c0_13 = arith.constant 0 : index
    %11 = vector.load %arg6[%c5, %c0_13] : memref<6x128xf32, #tpu.memory_space<vmem>>, vector<1x1xf32>
    %12 = arith.truncf %1 : vector<8x32xf32> to vector<8x32xbf16>
    %c0_14 = arith.constant 0 : index
    %c0_15 = arith.constant 0 : index
    %13 = vector.load %arg2[%c0_14, %c0_15] : memref<32x128xbf16, #tpu.memory_space<vmem>>, vector<32x128xbf16>
    %cst = arith.constant dense<0.000000e+00> : vector<8x128xf32>
    %14 = tpu.matmul %12, %13, %cst {dimension_numbers = #tpu.dot_dimension_numbers<[1], [0], [0], [1], [0, 0, 1, 1], [], []>} : vector<8x32xbf16>, vector<32x128xbf16>, vector<8x128xf32> -> vector<8x128xf32>
    %15 = vector.broadcast %3 : vector<1x128xf32> to vector<8x128xf32>
    %16 = arith.addf %14, %15 : vector<8x128xf32>
    %cst_16 = arith.constant dense<0.000000e+00> : vector<8xf32>
    %17 = vector.multi_reduction <add>, %16, %cst_16 [1] : vector<8x128xf32> to vector<8xf32>
    %18 = vector.shape_cast %17 : vector<8xf32> to vector<8x1xf32>
    %cst_17 = arith.constant 1.280000e+02 : f32
    %19 = vector.broadcast %cst_17 : f32 to vector<8x1xf32>
    %20 = arith.divf %18, %19 : vector<8x1xf32>
    %21 = vector.broadcast %20 : vector<8x1xf32> to vector<8x128xf32>
    %22 = arith.subf %16, %21 : vector<8x128xf32>
    %23 = arith.mulf %22, %22 : vector<8x128xf32>
    %cst_18 = arith.constant dense<0.000000e+00> : vector<8xf32>
    %24 = vector.multi_reduction <add>, %23, %cst_18 [1] : vector<8x128xf32> to vector<8xf32>
    %25 = vector.shape_cast %24 : vector<8xf32> to vector<8x1xf32>
    %cst_19 = arith.constant 1.280000e+02 : f32
    %26 = vector.broadcast %cst_19 : f32 to vector<8x1xf32>
    %27 = arith.divf %25, %26 : vector<8x1xf32>
    %cst_20 = arith.constant 9.99999974E-6 : f32
    %28 = vector.broadcast %cst_20 : f32 to vector<8x1xf32>
    %29 = arith.addf %27, %28 : vector<8x1xf32>
    %30 = math.rsqrt %29 : vector<8x1xf32>
    %31 = vector.broadcast %30 : vector<8x1xf32> to vector<8x128xf32>
    %32 = arith.mulf %22, %31 : vector<8x128xf32>
    %33 = vector.broadcast %4 : vector<1x128xf32> to vector<8x128xf32>
    %34 = arith.mulf %32, %33 : vector<8x128xf32>
    %35 = vector.broadcast %5 : vector<1x128xf32> to vector<8x128xf32>
    %36 = arith.addf %34, %35 : vector<8x128xf32>
    %cst_21 = arith.constant 0.000000e+00 : f32
    %37 = vector.broadcast %cst_21 : f32 to vector<8x128xf32>
    %38 = arith.maximumf %36, %37 : vector<8x128xf32>
    %39 = arith.truncf %38 : vector<8x128xf32> to vector<8x128xbf16>
    %c0_22 = arith.constant 0 : index
    %c0_23 = arith.constant 0 : index
    %40 = vector.load %arg3[%c0_22, %c0_23] : memref<128x128xbf16, #tpu.memory_space<vmem>>, vector<128x128xbf16>
    %cst_24 = arith.constant dense<0.000000e+00> : vector<8x128xf32>
    %41 = tpu.matmul %39, %40, %cst_24 {dimension_numbers = #tpu.dot_dimension_numbers<[1], [0], [0], [1], [0, 0, 1, 1], [], []>} : vector<8x128xbf16>, vector<128x128xbf16>, vector<8x128xf32> -> vector<8x128xf32>
    %42 = vector.broadcast %6 : vector<1x128xf32> to vector<8x128xf32>
    %43 = arith.addf %41, %42 : vector<8x128xf32>
    %cst_25 = arith.constant dense<0.000000e+00> : vector<8xf32>
    %44 = vector.multi_reduction <add>, %43, %cst_25 [1] : vector<8x128xf32> to vector<8xf32>
    %45 = vector.shape_cast %44 : vector<8xf32> to vector<8x1xf32>
    %cst_26 = arith.constant 1.280000e+02 : f32
    %46 = vector.broadcast %cst_26 : f32 to vector<8x1xf32>
    %47 = arith.divf %45, %46 : vector<8x1xf32>
    %48 = vector.broadcast %47 : vector<8x1xf32> to vector<8x128xf32>
    %49 = arith.subf %43, %48 : vector<8x128xf32>
    %50 = arith.mulf %49, %49 : vector<8x128xf32>
    %cst_27 = arith.constant dense<0.000000e+00> : vector<8xf32>
    %51 = vector.multi_reduction <add>, %50, %cst_27 [1] : vector<8x128xf32> to vector<8xf32>
    %52 = vector.shape_cast %51 : vector<8xf32> to vector<8x1xf32>
    %cst_28 = arith.constant 1.280000e+02 : f32
    %53 = vector.broadcast %cst_28 : f32 to vector<8x1xf32>
    %54 = arith.divf %52, %53 : vector<8x1xf32>
    %cst_29 = arith.constant 9.99999974E-6 : f32
    %55 = vector.broadcast %cst_29 : f32 to vector<8x1xf32>
    %56 = arith.addf %54, %55 : vector<8x1xf32>
    %57 = math.rsqrt %56 : vector<8x1xf32>
    %58 = vector.broadcast %57 : vector<8x1xf32> to vector<8x128xf32>
    %59 = arith.mulf %49, %58 : vector<8x128xf32>
    %60 = vector.broadcast %7 : vector<1x128xf32> to vector<8x128xf32>
    %61 = arith.mulf %59, %60 : vector<8x128xf32>
    %62 = vector.broadcast %8 : vector<1x128xf32> to vector<8x128xf32>
    %63 = arith.addf %61, %62 : vector<8x128xf32>
    %64 = arith.truncf %2 : vector<8x8xf32> to vector<8x8xbf16>
    %c0_30 = arith.constant 0 : index
    %c0_31 = arith.constant 0 : index
    %65 = vector.load %arg4[%c0_30, %c0_31] : memref<8x128xbf16, #tpu.memory_space<vmem>>, vector<8x128xbf16>
    %cst_32 = arith.constant dense<0.000000e+00> : vector<8x128xf32>
    %66 = tpu.matmul %64, %65, %cst_32 {dimension_numbers = #tpu.dot_dimension_numbers<[1], [0], [0], [1], [0, 0, 1, 1], [], []>} : vector<8x8xbf16>, vector<8x128xbf16>, vector<8x128xf32> -> vector<8x128xf32>
    %67 = vector.broadcast %9 : vector<1x128xf32> to vector<8x128xf32>
    %68 = arith.addf %66, %67 : vector<8x128xf32>
    %cst_33 = arith.constant 0.000000e+00 : f32
    %69 = vector.broadcast %cst_33 : f32 to vector<8x128xf32>
    %70 = arith.maximumf %68, %69 : vector<8x128xf32>
    %71 = arith.addf %63, %70 : vector<8x128xf32>
    %cst_34 = arith.constant 0.000000e+00 : f32
    %72 = vector.broadcast %cst_34 : f32 to vector<8x128xf32>
    %73 = arith.maximumf %71, %72 : vector<8x128xf32>
    %74 = vector.broadcast %10 : vector<1x128xf32> to vector<8x128xf32>
    %75 = arith.mulf %73, %74 : vector<8x128xf32>
    %cst_35 = arith.constant dense<0.000000e+00> : vector<8xf32>
    %76 = vector.multi_reduction <add>, %75, %cst_35 [1] : vector<8x128xf32> to vector<8xf32>
    %77 = vector.shape_cast %76 : vector<8xf32> to vector<8x1xf32>
    %78 = vector.broadcast %11 : vector<1x1xf32> to vector<8x1xf32>
    %79 = arith.addf %77, %78 : vector<8x1xf32>
    %80 = vector.shape_cast %79 : vector<8x1xf32> to vector<1x8xf32>
    %c0_36 = arith.constant 0 : index
    %c0_37 = arith.constant 0 : index
    %81 = vector.load %arg7[%c0_36, %c0_37] : memref<1x8xf32, #tpu.memory_space<vmem>>, vector<1x8xf32>
    tpu.vector_store %arg7[%c0_36, %c0_37], %80 {strides = array<i32>} : memref<1x8xf32, #tpu.memory_space<vmem>>, vector<1x8xf32>,
    return
  }
  func.func @transform_0(%arg0: i32) -> (i32, i32) {
    %c0_i32 = arith.constant 0 : i32
    %c0_i32_0 = arith.constant 0 : i32
    return %arg0, %c0_i32 : i32, i32
  }
  func.func @transform_1(%arg0: i32) -> (i32, i32) {
    %c0_i32 = arith.constant 0 : i32
    %c0_i32_0 = arith.constant 0 : i32
    %c0_i32_1 = arith.constant 0 : i32
    return %c0_i32, %c0_i32_0 : i32, i32
  }
  func.func @transform_2(%arg0: i32) -> (i32, i32) {
    %c0_i32 = arith.constant 0 : i32
    %c0_i32_0 = arith.constant 0 : i32
    %c0_i32_1 = arith.constant 0 : i32
    return %c0_i32, %c0_i32_0 : i32, i32
  }
  func.func @transform_3(%arg0: i32) -> (i32, i32) {
    %c0_i32 = arith.constant 0 : i32
    %c0_i32_0 = arith.constant 0 : i32
    %c0_i32_1 = arith.constant 0 : i32
    return %c0_i32, %c0_i32_0 : i32, i32
  }
  func.func @transform_4(%arg0: i32) -> (i32, i32) {
    %c0_i32 = arith.constant 0 : i32
    %c0_i32_0 = arith.constant 0 : i32
    %c0_i32_1 = arith.constant 0 : i32
    return %c0_i32, %c0_i32_0 : i32, i32
  }
  func.func @transform_5(%arg0: i32) -> (i32, i32) {
    %c0_i32 = arith.constant 0 : i32
    %c0_i32_0 = arith.constant 0 : i32
    %c0_i32_1 = arith.constant 0 : i32
    return %c0_i32, %c0_i32_0 : i32, i32
  }
  func.func @transform_6(%arg0: i32) -> (i32, i32) {
    %c0_i32 = arith.constant 0 : i32
    %c0_i32_0 = arith.constant 0 : i32
    return %c0_i32, %arg0 : i32, i32
  }
}

</mosaic_0001>

<bundles_post_ra>
// kernel: tpu_custom_call.1
= control target key start
LH: loop header
LB: loop body
LE: loop exit
PB: predicated region body
PF: predicated region fallthrough
CT: control target
= control target key end

     0   :  { %11 = vsyncpa [#allocation3], 0  ;;  %s688_s0 = inlined_call_operand.hbm [shape: f32[8,40], index: 0, kind: input, shape index: {}]   ;;  %s689_s1 = inlined_call_operand.hbm [shape: bf16[32,128], index: 1, kind: input, shape index: {}]   ;;  %s690_s2 = inlined_call_operand.hbm [shape: bf16[128,128], index: 2, kind: input, shape index: {}]   ;;  %s691_s3 = inlined_call_operand.hbm [shape: bf16[8,128], index: 3, kind: input, shape index: {}]   ;;  %s692_s4 = inlined_call_operand.hbm [shape: f32[3,128], index: 4, kind: input, shape index: {}]   ;;  %s693_s5 = inlined_call_operand.hbm [shape: f32[6,128], index: 5, kind: input, shape index: {}]   ;;  %s694_s6 = inlined_call_operand.hbm [shape: f32[1,8], index: 6, kind: output, shape index: {}]  }
   0x1   :  { %12 = vsyncpa [#allocation6], 0 }
   0x2   :  { %13 = vsyncpa [#allocation9], 0 }
   0x3   :  { %14 = vsyncpa [#allocation12], 0  ;;  %s31_s23 = sshll.u32 %s689_s1, 4  ;;  %s32_s23 = int_to_ptr.hbm [resolvable:$true] %s31_s23 }
   0x4   :  { %15 = vsyncpa [#allocation4], 0  ;;  %s614_s24 = smov [#allocation5]   ;;  %s58_s28 = sshll.u32 %s691_s3, 4  ;;  %s59_s28 = int_to_ptr.hbm [resolvable:$true] %s58_s28 }
   0x5   :  { %s33_s25 = sshll.u32 %s614_s24, 4  ;;  %s615_s29 = smov 64   ;;  %s34_s25 = int_to_ptr.vmem [resolvable:$true] %s33_s25 }
   0x6   :  { %s616_s30 = smov 4   ;;  %s617_s7 = smov [#allocation8]  }
   0x7   :  { %39 = dma.hbm_to_vmem [thread:$0]  %s32_s23, 256, %s34_s25, [#allocation6], %s615_s29, %s615_s29, %s616_s30  }
   0x8   :  { %s60_s8 = sshll.u32 %s617_s7, 4  ;;  %s21_s11 = sshll.u32 %s688_s0, 4  ;;  %s61_s8 = int_to_ptr.vmem [resolvable:$true] %s60_s8  ;;  %s22_s11 = int_to_ptr.hbm [resolvable:$true] %s21_s11 }
   0x9   :  { %63 = dma.hbm_to_vmem [thread:$0]  %s59_s28, 64, %s61_s8, [#allocation9]  }
   0xa   :  { %s44_s13 = sshll.u32 %s690_s2, 4  ;;  %s618_s14 = smov [#allocation2]   ;;  %s45_s13 = int_to_ptr.hbm [resolvable:$true] %s44_s13 }
   0xb   :  { %s23_s15 = sshll.u32 %s618_s14, 4  ;;  %s619_s3 = smov [#allocation7]   ;;  %s24_s15 = int_to_ptr.vmem [resolvable:$true] %s23_s15 }
   0xc   :  { %26 = dma.hbm_to_vmem [thread:$0]  %s22_s11, 128, %s24_s15, [#allocation3]  }
   0xd   :  { %s46_s16 = sshll.u32 %s619_s3, 4  ;;  %s69_s19 = sshll.u32 %s692_s4, 4  ;;  %s47_s16 = int_to_ptr.vmem [resolvable:$true] %s46_s16  ;;  %s70_s19 = int_to_ptr.hbm [resolvable:$true] %s69_s19 }
   0xe   :  { %52 = dma.hbm_to_vmem [thread:$0]  %s45_s13, 1024, %s47_s16, [#allocation6], %s615_s29, %s615_s29, %s616_s30  }
   0xf   :  { %s80_s21 = sshll.u32 %s693_s5, 4  ;;  %s620_s22 = smov [#allocation10]   ;;  %s81_s21 = int_to_ptr.hbm [resolvable:$true] %s80_s21 }
  0x10   :  { %s71_s2 = sshll.u32 %s620_s22, 4  ;;  %s621_s23 = smov [#allocation11]   ;;  %s72_s2 = int_to_ptr.vmem [resolvable:$true] %s71_s2 }
  0x11   :  { %74 = dma.hbm_to_vmem [thread:$0]  %s70_s19, 64, %s72_s2, [#allocation9]  }
  0x12   :  { %s82_s24 = sshll.u32 %s621_s23, 4  ;;  %s83_s24 = int_to_ptr.vmem [resolvable:$true] %s82_s24 }
  0x13   :  { %85 = dma.hbm_to_vmem [thread:$0]  %s81_s21, 128, %s83_s24, [#allocation12]  }
  0x14   :  { %604 = dma.done.wait [#allocation3], 128  }
  0x15   :  { %605 = vsyncadd [#allocation3], 4294967168 }
  0x16   :  { %606 = dma.done.wait [#allocation6], 1280  }
  0x17   :  { %607 = vsyncadd [#allocation6], 4294966016 }
  0x18   :  { %608 = dma.done.wait [#allocation9], 128  }
  0x19   :  { %609 = vsyncadd [#allocation9], 4294967168 }
  0x1a   :  { %610 = dma.done.wait [#allocation12], 128  }
  0x1b   :  { %611 = vsyncadd [#allocation12], 4294967168  ;;  %v399_v0 = vld [vmem:[#allocation5 + $0x8] sm:$0xff]  ;;  %v398_v1 = vld [vmem:[#allocation5] sm:$0xff]  ;;  %vm139_vm0 = vcmask 261120   ;;  %v622_v8 = vmov 128.0  }
  0x1c   :  { %v111_v2 = vld [vmem:[#allocation2] sm:$0xff]  ;;  %149 = vmatpush.bf16.msra.mxu0 %v399_v0  ;;  %v421_v4 = vld [vmem:[#allocation10] ss:$0 sm:$0xff]  ;;  %430 = vrcp.f32 %v622_v8  ;;  %s623_s4 = smov 96   ;;  %v407_v19 = vld [vmem:[#allocation7 + $0x38] sm:$0xff]  ;;  %vm300_vm5 = vcmask 1043456  }
  0x1d   :  { %v121_v3 = vpack.c.bf16 %v111_v2, %v111_v2  ;;  %254 = vmatpush.bf16.msra.mxu1 %v407_v19  ;;  %v406_v20 = vld [vmem:[#allocation7 + $0x30] sm:$0xff]  ;;  %v405_v21 = vld [vmem:[#allocation7 + $0x28] sm:$0xff]  ;;  %v404_v22 = vld [vmem:[#allocation7 + $0x20] sm:$0xff]  ;;  %vm296_vm6 = vcmask 64512   ;;  %v330_v19 = vlaneseq  ;;  %s625_s5 = smov [#allocation13]   ;;  %s343_s28 = sshll.u32 %s694_s6, 4  ;;  %s344_s28 = int_to_ptr.hbm [resolvable:$true] %s343_s28 }
  0x1e   :  { %v403_v23 = vld [vmem:[#allocation7 + $0x18] sm:$0xff]  ;;  %v402_v24 = vld [vmem:[#allocation7 + $0x10] sm:$0xff]  ;;  %v401_v25 = vld [vmem:[#allocation7 + $0x8] sm:$0xff]  ;;  %s341_s25 = sshll.u32 %s625_s5, 4  ;;  %vm334_vm10 = vcmask 57344   ;;  %s342_s25 = int_to_ptr.vmem [resolvable:$true] %s341_s25 }
  0x1f   :  { %294 = vrot.lane.b32.xlu1 %v121_v3, %s623_s4  ;;  %v400_v26 = vld [vmem:[#allocation7] sm:$0xff]  ;;  %v424_v47 = vld [vmem:[#allocation11] ss:$0 sm:$0xff] }
  0x20   :  { %150 = vmatpush.bf16.msra.mxu0 %v398_v1  ;;  %v422_v36 = vld [vmem:[#allocation10 + $0x1] ss:$0 sm:$0xff]  ;;  %v423_v39 = vld [vmem:[#allocation10 + $0x2] ss:$0 sm:$0xff]  ;;  %v291_v44 = vld [vmem:[#allocation8] sm:$0xf] }
  0x21   :  { %255 = vmatpush.bf16.msra.mxu1 %v406_v20  ;;  %v302_v45 = vsel %vm300_vm5, %v291_v44, 0  ;;  %v425_v1 = vld [vmem:[#allocation11 + $0x3] ss:$0 sm:$0xff]  ;;  %v331_v20 = vand.u32 127, %v330_v19 }
  0x22   :  { %v431_v9 = vpop.eup %430  ;;  %311 = vmatpush.bf16.msra.mxu2 %v302_v45 }
  0x23   :  { %364 = vmatmul.msk.bf16.vlgmr.msra.gmra.mxu0 %vm139_vm0, %v121_v3  ;;  %v159_v10 = vmul.f32 128.0, %v431_v9  ;;  %vm163_vm1 = vweird.f32 %v431_v9  ;;  %v426_v3 = vld [vmem:[#allocation11 + $0x1] ss:$0 sm:$0xff] }
  0x25   :  { %v160_v11 = vsub.f32 1.0, %v159_v10  ;;  %256 = vmatpush.bf16.msra.mxu1 %v405_v21 }
  0x27   :  { %v161_v12 = vmul.f32 %v431_v9, %v160_v11 }
  0x29   :  { %v162_v13 = vadd.f32 %v431_v9, %v161_v12  ;;  %257 = vmatpush.bf16.msra.mxu1 %v404_v22  ;;  %v428_v12 = vld [vmem:[#allocation11 + $0x4] ss:$0 sm:$0xff] }
  0x2b   :  { %v679_v14 = vsel %vm163_vm1, %v431_v9, %v162_v13 }
  0x2d   :  { %258 = vmatpush.bf16.msra.mxu1 %v403_v23 }
  0x31   :  { %259 = vmatpush.bf16.msra.mxu1 %v402_v24 }
  0x35   :  { %260 = vmatpush.bf16.msra.mxu1 %v401_v25 }
  0x39   :  { %261 = vmatpush.bf16.msra.mxu1 %v400_v26 }
  0x91   :  { %v295_v46 = vpop.permute.xlu1 %294 }
  0x92   :  { %397 = vmatmul.msk.bf16.vlgmr.msra.gmra.mxu2 %vm296_vm6, %v295_v46 }
  0xa0   :  { %v152_v5 = vpop.f32.mrf.mxu0 }
  0xa1   :  { %v153_v6 = vadd.f32 %v421_v4, %v152_v5 }
  0xa3   :  { %156 = vadd.xlane.f32.xlu0 %v153_v6 }
  0xa8   :  { %v154_v7 = vpop.f32.mrf.mxu0 }
  0xa9   :  { %v427_v7 = vld [vmem:[#allocation11 + $0x2] ss:$0 sm:$0xff] }
 0x115   :  { %v313_v51 = vpop.f32.mrf.mxu2 }
 0x116   :  { %v157_v15 = vpop.xlane.xlu0 %156  ;;  %v314_v5 = vadd.f32 %v425_v1, %v313_v51 }
 0x117   :  { %v165_v16 = vmul.f32 %v679_v14, %v157_v15  ;;  %v624_v15 = vmov 0  }
 0x118   :  { %v317_v9 = vmax.f32 %v314_v5, 0.0  ;;  %420 = vset.pattern.permute.xlu0 %v624_v15 }
 0x119   :  { %v166_v17 = vsub.f32 %v153_v6, %v165_v16  ;;  %v429_v16 = vld [vmem:[#allocation11 + $0x5] ss:$0 sm:$0xff] }
 0x11b   :  { %v167_v18 = vmul.f32 %v166_v17, %v166_v17 }
 0x11d   :  { %168 = vadd.xlane.f32.xlu0 %v167_v18  ;;  %v315_v54 = vpop.f32.mrf.mxu2 }
 0x190   :  { %v169_v27 = vpop.xlane.xlu0 %168 }
 0x191   :  { %v170_v28 = vmul.f32 %v169_v27, %v679_v14 }
 0x193   :  { %v171_v29 = vadd.f32 1e-05, %v170_v28 }
 0x195   :  { %432 = vrsqrt.f32 %v171_v29  ;;  %vm178_vm3 = vweird.f32 %v171_v29 }
 0x19b   :  { %v433_v30 = vpop.eup %432 }
 0x19c   :  { %v173_v31 = vmul.f32 %v433_v30, %v171_v29  ;;  %vm179_vm2 = vweird.f32 %v433_v30 }
 0x19d   :  { %vm180_vm4 = vmor %vm178_vm3, %vm179_vm2 }
 0x19e   :  { %v174_v32 = vmul.f32 %v433_v30, %v173_v31 }
 0x1a0   :  { %v175_v33 = vmul.f32 0.5, %v174_v32 }
 0x1a2   :  { %v176_v34 = vsub.f32 1.5, %v175_v33 }
 0x1a4   :  { %v177_v35 = vmul.f32 %v433_v30, %v176_v34 }
 0x1a6   :  { %v181_v37 = vsel %vm180_vm4, %v433_v30, %v177_v35 }
 0x1a7   :  { %v182_v38 = vmul.f32 %v181_v37, %v166_v17 }
 0x1a9   :  { %v184_v40 = vmul.f32 %v422_v36, %v182_v38 }
 0x1ab   :  { %v186_v41 = vadd.f32 %v423_v39, %v184_v40 }
 0x1ad   :  { %v187_v42 = vmax.f32 %v186_v41, 0.0 }
 0x1af   :  { %v188_v43 = vpack.c.bf16 %v187_v42, %v187_v42 }
 0x1b1   :  { %262 = vmatmul.bf16.vlgmr.msra.gmra.mxu1 %v188_v43 }
 0x22e   :  { %v263_v48 = vpop.f32.mrf.mxu1 }
 0x22f   :  { %v264_v49 = vadd.f32 %v424_v47, %v263_v48 }
 0x231   :  { %267 = vadd.xlane.f32.xlu1 %v264_v49 }
 0x236   :  { %v265_v50 = vpop.f32.mrf.mxu1 }
 0x2a4   :  { %v268_v52 = vpop.xlane.xlu1 %267 }
 0x2a5   :  { %v269_v53 = vmul.f32 %v268_v52, %v679_v14 }
 0x2a7   :  { %v270_v55 = vsub.f32 %v264_v49, %v269_v53 }
 0x2a9   :  { %v271_v56 = vmul.f32 %v270_v55, %v270_v55 }
 0x2ab   :  { %272 = vadd.xlane.f32.xlu2 %v271_v56 }
 0x31e   :  { %v273_v57 = vpop.xlane.xlu2 %272 }
 0x31f   :  { %v274_v58 = vmul.f32 %v273_v57, %v679_v14 }
 0x321   :  { %v275_v59 = vadd.f32 1e-05, %v274_v58 }
 0x323   :  { %434 = vrsqrt.f32 %v275_v59  ;;  %vm282_vm8 = vweird.f32 %v275_v59 }
 0x329   :  { %v435_v60 = vpop.eup %434 }
 0x32a   :  { %v277_v61 = vmul.f32 %v435_v60, %v275_v59  ;;  %vm283_vm7 = vweird.f32 %v435_v60 }
 0x32b   :  { %vm284_vm9 = vmor %vm282_vm8, %vm283_vm7 }
 0x32c   :  { %v278_v62 = vmul.f32 %v435_v60, %v277_v61 }
 0x32e   :  { %v279_v63 = vmul.f32 0.5, %v278_v62 }
 0x330   :  { %v280_v0 = vsub.f32 1.5, %v279_v63 }
 0x332   :  { %v281_v2 = vmul.f32 %v435_v60, %v280_v0 }
 0x334   :  { %v285_v4 = vsel %vm284_vm9, %v435_v60, %v281_v2 }
 0x335   :  { %v286_v6 = vmul.f32 %v285_v4, %v270_v55 }
 0x337   :  { %v288_v8 = vmul.f32 %v426_v3, %v286_v6 }
 0x339   :  { %v290_v10 = vadd.f32 %v427_v7, %v288_v8 }
 0x33b   :  { %v318_v11 = vadd.f32 %v317_v9, %v290_v10 }
 0x33d   :  { %v319_v13 = vmax.f32 %v318_v11, 0.0 }
 0x33f   :  { %v321_v14 = vmul.f32 %v428_v12, %v319_v13 }
 0x341   :  { %322 = vadd.xlane.f32.xlu2 %v321_v14 }
 0x3b4   :  { %v323_v17 = vpop.xlane.xlu2 %322 }
 0x3b5   :  { %v325_v18 = vadd.f32 %v429_v16, %v323_v17 }
 0x3b7   :  { %328 = vperm.xlu0 %420, %v325_v18  }
 0x429   :  { %v329_v21 = vpop.permute.xlu0 %328 }
 0x42a   :  { %v332_v22 = vperm.slane %v329_v21, %v331_v20 }
 0x42c   :  { %335 = vst.msk [vmem:[#allocation13] sm:$0x1] %vm334_vm10, %v332_v22 }
 0x42d   :  { %346 = dma.vmem_to_hbm [thread:$0]  %s342_s25, 16, %s344_s28, [#allocation4]  }
 0x42e   :  { %612 = dma.done.wait [#allocation4], 16  }
 0x42f   :  { %613 = vsyncadd [#allocation4], 4294967280 }
 0x430   :  { %351 = vsyncpa [#allocation3], 1 }
 0x431   :  { %352 = vsyncpa [#allocation6], 1 }
 0x432   :  { %353 = vsyncpa [#allocation9], 1 }
 0x433   :  { %354 = vsyncpa [#allocation12], 1 }
 0x434   :  { %355 = vsyncpa [#allocation4], 1 }

</bundles_post_ra>
